<compile_context>
chip_gen: v7x
topology: tpu7x:2x2x1
jax: 0.10.0
libtpu: 0.0.40
codegen_flags: <defaults>
</compile_context>

<pallas_src>
import functools

import jax
import jax.numpy as jnp
from jax.experimental import pallas as pl
from jax.experimental.pallas import tpu as pltpu


def _soft_dice_kernel(p_ref, t_ref, out_ref,
                      inter_acc, p_acc, t_acc,
                      *, total_cols, block_cols, num_rows, smooth, needs_mask):
    j = pl.program_id(0)

    # init accumulators on the first tile
    @pl.when(j == 0)
    def _init():
        inter_acc[...] = jnp.zeros_like(inter_acc)
        p_acc[...] = jnp.zeros_like(p_acc)
        t_acc[...] = jnp.zeros_like(t_acc)

    p = p_ref[...].astype(jnp.float32)          # (N, tn)  lane-dense
    t = t_ref[...].astype(jnp.float32)          # (N, tn)

    if needs_mask:
        # mask lanes past the true column count (ragged last tile only matters,
        # but the select is cheap filler in this memory-bound kernel)
        col = j * block_cols + jax.lax.broadcasted_iota(jnp.int32, p.shape, 1)
        valid = col < total_cols
        p = jnp.where(valid, p, 0.0)
        t = jnp.where(valid, t, 0.0)

    # per-row partial reductions (cross-lane reduce goes to the XLU slot,
    # which has slack in this memory-bound kernel)
    inter_acc[...] += jnp.sum(p * t, axis=1, keepdims=True)   # (N, 1)
    p_acc[...] += jnp.sum(p, axis=1, keepdims=True)           # (N, 1)
    t_acc[...] += jnp.sum(t, axis=1, keepdims=True)           # (N, 1)

    # finalize only on the last tile
    @pl.when(j == pl.num_programs(0) - 1)
    def _finalize():
        inter = inter_acc[...]
        psum = p_acc[...]
        tsum = t_acc[...]
        score = 2.0 * (inter + smooth) / (psum + tsum + smooth)   # (N, 1)
        out_ref[...] = (1.0 - jnp.sum(score) / num_rows).reshape(1, 1)


def soft_dice_loss(probs, targets, *, smooth=0.1, block_cols=None):
    """Pallas SoftDiceLoss.  probs: (N, ...) float; targets: (N, ...) same size."""
    num = probs.shape[0]
    p = probs.reshape(num, -1)          # contiguous reshape: free view, no HBM pass
    t = targets.reshape(num, -1)
    assert p.shape == t.shape, "probs/targets must have the same per-row size"
    m = p.shape[1]

    if block_cols is None:
        # ~2 MiB of f32 per input per tile, lane-aligned; with double buffering
        # of two inputs that is ~8 MiB of VMEM -> fits comfortably on
        # v5e/v6e (128 MiB VMEM) and v7x (64 MiB VMEM).
        target_elems = (2 << 20) // 4
        block_cols = max(128, (target_elems // max(num, 1)) // 128 * 128)
    m_padded = pl.cdiv(m, 128) * 128
    block_cols = min(block_cols, m_padded)
    grid = (pl.cdiv(m, block_cols),)
    needs_mask = (m % block_cols) != 0

    kernel = functools.partial(
        _soft_dice_kernel,
        total_cols=m,
        block_cols=block_cols,
        num_rows=float(num),
        smooth=float(smooth),
        needs_mask=needs_mask,
    )

    out = pl.pallas_call(
        kernel,
        out_shape=jax.ShapeDtypeStruct((1, 1), jnp.float32),
        grid_spec=pltpu.PrefetchScalarGridSpec(
            num_scalar_prefetch=0,
            grid=grid,
            in_specs=[
                pl.BlockSpec((num, block_cols), lambda j: (0, j)),  # probs tile
                pl.BlockSpec((num, block_cols), lambda j: (0, j)),  # target tile
            ],
            out_specs=pl.BlockSpec((1, 1), lambda j: (0, 0)),        # resident scalar
            scratch_shapes=[
                pltpu.VMEM((num, 1), jnp.float32),   # intersection sums
                pltpu.VMEM((num, 1), jnp.float32),   # probs sums
                pltpu.VMEM((num, 1), jnp.float32),   # target sums
            ],
        ),
        compiler_params=pltpu.CompilerParams(
            dimension_semantics=("arbitrary",),      # reduction axis (sequential)
        ),
    )(p, t)
    return out[0, 0]


def soft_dice_loss_ref(probs, targets, smooth=0.1):
    """Pure-JAX reference mirroring the PyTorch forward."""
    num = probs.shape[0]
    m1 = probs.reshape(num, -1)
    m2 = targets.reshape(num, -1)
    intersection = (m1 * m2).sum(axis=1)
    score = 2.0 * (intersection + smooth) / (m1.sum(axis=1) + m2.sum(axis=1) + smooth)
    return 1.0 - score.sum() / num


if __name__ == "__main__":
    key = jax.random.PRNGKey(0)
    k1, k2 = jax.random.split(key)

    N, C, H, W = 2, 4, 16, 16
    probs = jax.nn.sigmoid(jax.random.normal(k1, (N, C, H, W), dtype=jnp.float32))
    targets = (jax.random.uniform(k2, (N, C, H, W)) > 0.5).astype(jnp.float32)

    out = soft_dice_loss(probs, targets)
    out = jax.block_until_ready(out)

    ref = soft_dice_loss_ref(probs, targets)
    assert jnp.allclose(out, ref, rtol=1e-5, atol=1e-6), (out, ref)

    print("KERNEL_OK")
</pallas_src>

<mosaic_0001>
module attributes {stable_mosaic.version = 11 : i64} {
  func.func @_soft_dice_kernel(%arg0: i32, %arg1: memref<2x1024xf32, #tpu.memory_space<vmem>>, %arg2: memref<2x1024xf32, #tpu.memory_space<vmem>>, %arg3: memref<1x1xf32, #tpu.memory_space<vmem>>, %arg4: memref<2x1xf32, #tpu.memory_space<vmem>>, %arg5: memref<2x1xf32, #tpu.memory_space<vmem>>, %arg6: memref<2x1xf32, #tpu.memory_space<vmem>>) attributes {dimension_semantics = [#tpu.dimension_semantics<arbitrary>], iteration_bounds = array<i64: 1>, scalar_prefetch = 0 : i64, scratch_operands = 3 : i64, tpu.core_type = #tpu.core_type<tc>, window_params = [{transform_indices = @transform_0, window_bounds = array<i64: 2, 1024>}, {transform_indices = @transform_1, window_bounds = array<i64: 2, 1024>}, {pipeline_mode = #tpu.pipeline_mode<synchronous>, transform_indices = @transform_2, window_bounds = array<i64: 1, 1>}]} {
    %c0_i32 = arith.constant 0 : i32
    %0 = arith.cmpi eq, %arg0, %c0_i32 : i32
    %1 = arith.extui %0 : i1 to i32
    %c0_i32_0 = arith.constant 0 : i32
    %2 = arith.cmpi ne, %1, %c0_i32_0 : i32
    scf.if %2 {
      %cst_20 = arith.constant 0.000000e+00 : f32
      %24 = vector.broadcast %cst_20 : f32 to vector<2x1xf32>
      %c0_21 = arith.constant 0 : index
      %c0_22 = arith.constant 0 : index
      %25 = vector.load %arg4[%c0_21, %c0_22] : memref<2x1xf32, #tpu.memory_space<vmem>>, vector<2x1xf32>
      tpu.vector_store %arg4[%c0_21, %c0_22], %24 {strides = array<i32>} : memref<2x1xf32, #tpu.memory_space<vmem>>, vector<2x1xf32>,
      %cst_23 = arith.constant 0.000000e+00 : f32
      %26 = vector.broadcast %cst_23 : f32 to vector<2x1xf32>
      %c0_24 = arith.constant 0 : index
      %c0_25 = arith.constant 0 : index
      %27 = vector.load %arg5[%c0_24, %c0_25] : memref<2x1xf32, #tpu.memory_space<vmem>>, vector<2x1xf32>
      tpu.vector_store %arg5[%c0_24, %c0_25], %26 {strides = array<i32>} : memref<2x1xf32, #tpu.memory_space<vmem>>, vector<2x1xf32>,
      %cst_26 = arith.constant 0.000000e+00 : f32
      %28 = vector.broadcast %cst_26 : f32 to vector<2x1xf32>
      %c0_27 = arith.constant 0 : index
      %c0_28 = arith.constant 0 : index
      %29 = vector.load %arg6[%c0_27, %c0_28] : memref<2x1xf32, #tpu.memory_space<vmem>>, vector<2x1xf32>
      tpu.vector_store %arg6[%c0_27, %c0_28], %28 {strides = array<i32>} : memref<2x1xf32, #tpu.memory_space<vmem>>, vector<2x1xf32>,
    } else {
    }
    %c0 = arith.constant 0 : index
    %c0_1 = arith.constant 0 : index
    %3 = vector.load %arg1[%c0, %c0_1] : memref<2x1024xf32, #tpu.memory_space<vmem>>, vector<2x1024xf32>
    %c0_2 = arith.constant 0 : index
    %c0_3 = arith.constant 0 : index
    %4 = vector.load %arg2[%c0_2, %c0_3] : memref<2x1024xf32, #tpu.memory_space<vmem>>, vector<2x1024xf32>
    %c0_4 = arith.constant 0 : index
    %c0_5 = arith.constant 0 : index
    %5 = vector.load %arg4[%c0_4, %c0_5] : memref<2x1xf32, #tpu.memory_space<vmem>>, vector<2x1xf32>
    %6 = arith.mulf %3, %4 : vector<2x1024xf32>
    %cst = arith.constant dense<0.000000e+00> : vector<2xf32>
    %7 = vector.multi_reduction <add>, %6, %cst [1] : vector<2x1024xf32> to vector<2xf32>
    %8 = vector.shape_cast %7 : vector<2xf32> to vector<2x1xf32>
    %9 = arith.addf %5, %8 : vector<2x1xf32>
    %c0_6 = arith.constant 0 : index
    %c0_7 = arith.constant 0 : index
    %10 = vector.load %arg4[%c0_6, %c0_7] : memref<2x1xf32, #tpu.memory_space<vmem>>, vector<2x1xf32>
    tpu.vector_store %arg4[%c0_6, %c0_7], %9 {strides = array<i32>} : memref<2x1xf32, #tpu.memory_space<vmem>>, vector<2x1xf32>,
    %c0_8 = arith.constant 0 : index
    %c0_9 = arith.constant 0 : index
    %11 = vector.load %arg5[%c0_8, %c0_9] : memref<2x1xf32, #tpu.memory_space<vmem>>, vector<2x1xf32>
    %cst_10 = arith.constant dense<0.000000e+00> : vector<2xf32>
    %12 = vector.multi_reduction <add>, %3, %cst_10 [1] : vector<2x1024xf32> to vector<2xf32>
    %13 = vector.shape_cast %12 : vector<2xf32> to vector<2x1xf32>
    %14 = arith.addf %11, %13 : vector<2x1xf32>
    %c0_11 = arith.constant 0 : index
    %c0_12 = arith.constant 0 : index
    %15 = vector.load %arg5[%c0_11, %c0_12] : memref<2x1xf32, #tpu.memory_space<vmem>>, vector<2x1xf32>
    tpu.vector_store %arg5[%c0_11, %c0_12], %14 {strides = array<i32>} : memref<2x1xf32, #tpu.memory_space<vmem>>, vector<2x1xf32>,
    %c0_13 = arith.constant 0 : index
    %c0_14 = arith.constant 0 : index
    %16 = vector.load %arg6[%c0_13, %c0_14] : memref<2x1xf32, #tpu.memory_space<vmem>>, vector<2x1xf32>
    %cst_15 = arith.constant dense<0.000000e+00> : vector<2xf32>
    %17 = vector.multi_reduction <add>, %4, %cst_15 [1] : vector<2x1024xf32> to vector<2xf32>
    %18 = vector.shape_cast %17 : vector<2xf32> to vector<2x1xf32>
    %19 = arith.addf %16, %18 : vector<2x1xf32>
    %c0_16 = arith.constant 0 : index
    %c0_17 = arith.constant 0 : index
    %20 = vector.load %arg6[%c0_16, %c0_17] : memref<2x1xf32, #tpu.memory_space<vmem>>, vector<2x1xf32>
    tpu.vector_store %arg6[%c0_16, %c0_17], %19 {strides = array<i32>} : memref<2x1xf32, #tpu.memory_space<vmem>>, vector<2x1xf32>,
    %c0_i32_18 = arith.constant 0 : i32
    %21 = arith.cmpi eq, %arg0, %c0_i32_18 : i32
    %22 = arith.extui %21 : i1 to i32
    %c0_i32_19 = arith.constant 0 : i32
    %23 = arith.cmpi ne, %22, %c0_i32_19 : i32
    scf.if %23 {
      %c0_20 = arith.constant 0 : index
      %c0_21 = arith.constant 0 : index
      %24 = vector.load %arg4[%c0_20, %c0_21] : memref<2x1xf32, #tpu.memory_space<vmem>>, vector<2x1xf32>
      %c0_22 = arith.constant 0 : index
      %c0_23 = arith.constant 0 : index
      %25 = vector.load %arg5[%c0_22, %c0_23] : memref<2x1xf32, #tpu.memory_space<vmem>>, vector<2x1xf32>
      %c0_24 = arith.constant 0 : index
      %c0_25 = arith.constant 0 : index
      %26 = vector.load %arg6[%c0_24, %c0_25] : memref<2x1xf32, #tpu.memory_space<vmem>>, vector<2x1xf32>
      %cst_26 = arith.constant 1.000000e-01 : f32
      %27 = vector.broadcast %cst_26 : f32 to vector<2x1xf32>
      %28 = arith.addf %24, %27 : vector<2x1xf32>
      %cst_27 = arith.constant 2.000000e+00 : f32
      %29 = vector.broadcast %cst_27 : f32 to vector<2x1xf32>
      %30 = arith.mulf %29, %28 : vector<2x1xf32>
      %31 = arith.addf %25, %26 : vector<2x1xf32>
      %cst_28 = arith.constant 1.000000e-01 : f32
      %32 = vector.broadcast %cst_28 : f32 to vector<2x1xf32>
      %33 = arith.addf %31, %32 : vector<2x1xf32>
      %34 = arith.divf %30, %33 : vector<2x1xf32>
      %35 = vector.shape_cast %34 : vector<2x1xf32> to vector<1x2x1xf32>
      %cst_29 = arith.constant dense<0.000000e+00> : vector<1xf32>
      %36 = vector.multi_reduction <add>, %35, %cst_29 [1, 2] : vector<1x2x1xf32> to vector<1xf32>
      %37 = vector.shape_cast %36 : vector<1xf32> to vector<1x1x1xf32>
      %38 = vector.extract %37[0, 0, 0] : f32 from vector<1x1x1xf32>
      %cst_30 = arith.constant 2.000000e+00 : f32
      %39 = arith.divf %38, %cst_30 : f32
      %cst_31 = arith.constant 1.000000e+00 : f32
      %40 = arith.subf %cst_31, %39 : f32
      %41 = vector.broadcast %40 : f32 to vector<1x1xf32>
      %c0_32 = arith.constant 0 : index
      %c0_33 = arith.constant 0 : index
      %42 = vector.load %arg3[%c0_32, %c0_33] : memref<1x1xf32, #tpu.memory_space<vmem>>, vector<1x1xf32>
      tpu.vector_store %arg3[%c0_32, %c0_33], %41 {strides = array<i32>} : memref<1x1xf32, #tpu.memory_space<vmem>>, vector<1x1xf32>,
    } else {
    }
    return
  }
  func.func @transform_0(%arg0: i32) -> (i32, i32) {
    %c0_i32 = arith.constant 0 : i32
    %c0_i32_0 = arith.constant 0 : i32
    return %c0_i32, %arg0 : i32, i32
  }
  func.func @transform_1(%arg0: i32) -> (i32, i32) {
    %c0_i32 = arith.constant 0 : i32
    %c0_i32_0 = arith.constant 0 : i32
    return %c0_i32, %arg0 : i32, i32
  }
  func.func @transform_2(%arg0: i32) -> (i32, i32) {
    %c0_i32 = arith.constant 0 : i32
    %c0_i32_0 = arith.constant 0 : i32
    %c0_i32_1 = arith.constant 0 : i32
    return %c0_i32, %c0_i32_0 : i32, i32
  }
}

</mosaic_0001>

<bundles_post_ra>
// kernel: tpu_custom_call.1
= control target key start
LH: loop header
LB: loop body
LE: loop exit
PB: predicated region body
PF: predicated region fallthrough
CT: control target
= control target key end

     0   :  { %7 = vsyncpa [#allocation6], 0  ;;  %s475_s0 = inlined_call_operand.hbm [shape: f32[2,1024], index: 0, kind: input, shape index: {}]   ;;  %s476_s1 = inlined_call_operand.hbm [shape: f32[2,1024], index: 1, kind: input, shape index: {}]   ;;  %s477_s2 = inlined_call_operand.hbm [shape: f32[1,1], index: 2, kind: output, shape index: {}]  }
   0x1   :  { %8 = vsyncpa [#allocation9], 0 }
   0x2   :  { %9 = vsyncpa [#allocation7], 0  ;;  %s374_s9 = smov [#allocation5]   ;;  %s375_s11 = smov [#allocation8]  }
   0x3   :  { %s16_s10 = sshll.u32 %s374_s9, 4  ;;  %s26_s12 = sshll.u32 %s375_s11, 4  ;;  %s17_s10 = int_to_ptr.vmem [resolvable:$true] %s16_s10  ;;  %s27_s12 = int_to_ptr.vmem [resolvable:$true] %s26_s12 }
   0x4   :  { %s302_s15 = scalar_lea.hbm %s475_s0, 256 }
   0x5   :  { %p303_p0 = scmp.ne.s32.totalorder %s475_s0, %s302_s15  ;;  %p306_p1 = scmp.lt.u32.totalorder %s302_s15, %s475_s0 }
   0x7   :  { %p308_p2 = pnand %p306_p1, %p303_p0 }
   0x9   :  { %311 = shalt.err (!%p308_p2)
}
   0xa   :  { %s312_s20 = scalar_lea.vmem %s17_s10, 256  ;;  %p317_p4 = scmp.lt.s32.totalorder %s17_s10, %s17_s10 }
   0xb   :  { %p313_p3 = scmp.ne.s32.totalorder %s17_s10, %s312_s20  ;;  %p318_p5 = scmp.lt.s32.totalorder %s312_s20, %s312_s20 }
   0xd   :  { %p319_p6 = por %p318_p5, %p317_p4 }
   0xf   :  { %p320_p7 = pnand %p319_p6, %p313_p3 }
  0x11   :  { %323 = shalt.err (!%p320_p7)
}
  0x12   :  { %19 = dma.hbm_to_vmem [thread:$0]  %s475_s0, 256, %s17_s10, [#allocation6]  }
  0x13   :  { %s324_s25 = scalar_lea.hbm %s476_s1, 256 }
  0x14   :  { %p325_p8 = scmp.ne.s32.totalorder %s476_s1, %s324_s25  ;;  %p328_p9 = scmp.lt.u32.totalorder %s324_s25, %s476_s1 }
  0x16   :  { %p330_p10 = pnand %p328_p9, %p325_p8 }
  0x18   :  { %333 = shalt.err (!%p330_p10)
}
  0x19   :  { %s334_s30 = scalar_lea.vmem %s27_s12, 256  ;;  %p339_p12 = scmp.lt.s32.totalorder %s27_s12, %s27_s12 }
  0x1a   :  { %p335_p11 = scmp.ne.s32.totalorder %s27_s12, %s334_s30  ;;  %p340_p13 = scmp.lt.s32.totalorder %s334_s30, %s334_s30 }
  0x1c   :  { %p341_p0 = por %p340_p13, %p339_p12 }
  0x1e   :  { %p342_p1 = pnand %p341_p0, %p335_p11 }
  0x20   :  { %345 = shalt.err (!%p342_p1)
}
  0x21   :  { %29 = dma.hbm_to_vmem [thread:$0]  %s476_s1, 256, %s27_s12, [#allocation9]  }
  0x22   :  { %368 = dma.done.wait [#allocation6], 256  }
  0x23   :  { %369 = vsyncadd [#allocation6], 4294967040 }
  0x24   :  { %370 = dma.done.wait [#allocation9], 256  }
  0x25   :  { %371 = vsyncadd [#allocation9], 4294967040  ;;  %v57_v0 = vlaneseq  ;;  %vm40_vm0 = vcmask 1024   ;;  %v376_v1 = vmov 1983009808   ;;  %v377_v4 = vmov 0.0  }
  0x26   :  { %v55_v2 = vunpack.c.l.s4 %v376_v1  ;;  %42 = vst.msk [vmem:[#allocation3] sm:$0x3] %vm40_vm0, %v377_v4  ;;  %41 = vst.msk [vmem:[#allocation2] sm:$0x3] %vm40_vm0, %v377_v4  ;;  %v44_v7 = vld [vmem:[#allocation5] sm:$0xff]  ;;  %v45_v8 = vld [vmem:[#allocation5 + $0x8] sm:$0xff] }
  0x27   :  { %v58_v3 = vshrl.u32 %v57_v0, 7  ;;  %43 = vst.msk [vmem:[#allocation4] sm:$0x3] %vm40_vm0, %v377_v4  ;;  %v46_v9 = vld [vmem:[#allocation8] sm:$0xff]  ;;  %vm95_vm1 = vcmask 1041408   ;;  %v119_v10 = vcombine.high %v44_v7, %v44_v7  ;;  %v136_v12 = vcombine.high %v45_v8, %v45_v8  ;;  %v47_v13 = vld [vmem:[#allocation8 + $0x8] sm:$0xff] }
  0x28   :  { %v56_v5 = vunpack.c.0.s8 %v55_v2  ;;  %v183_v15 = vcombine.high %v46_v9, %v46_v9  ;;  %v200_v19 = vcombine.high %v47_v13, %v47_v13  ;;  %v49_v44 = vmul.f32 %v46_v9, %v44_v7  ;;  %s378_s5 = smov [#allocation10]  }
  0x29   :  { %v50_v48 = vmul.f32 %v47_v13, %v45_v8  ;;  %s279_s6 = sshll.u32 %s378_s5, 4  ;;  %vm271_vm2 = vcmask 0   ;;  %s280_s6 = int_to_ptr.vmem [resolvable:$true] %s279_s6 }
  0x2a   :  { %v421_v6 = vsub.s32 %v56_v5, %v58_v3  ;;  %v53_v51 = vcombine.high %v49_v44, %v49_v44  ;;  %s346_s8 = scalar_lea.vmem %s280_s6, 16  ;;  %s350_s9 = scalar_lea.vmem %s280_s6, 32 }
  0x2b   :  { %v70_v55 = vcombine.high %v50_v48, %v50_v48  ;;  %p347_p2 = scmp.ne.s32.totalorder %s280_s6, %s346_s8  ;;  %p351_p3 = scmp.lt.s32.totalorder %s280_s6, %s280_s6 }
  0x2c   :  { %v126_v11 = vrot.slane %v44_v7, %v421_v6  ;;  %v143_v14 = vrot.slane %v45_v8, %v421_v6  ;;  %v190_v16 = vrot.slane %v46_v9, %v421_v6  ;;  %v133_v17 = vrot.slane %v119_v10, %v421_v6  ;;  %p352_p4 = scmp.lt.s32.totalorder %s350_s9, %s346_s8 }
  0x2d   :  { %v197_v21 = vrot.slane %v183_v15, %v421_v6  ;;  %v207_v23 = vrot.slane %v47_v13, %v421_v6  ;;  %v150_v25 = vrot.slane %v136_v12, %v421_v6  ;;  %v214_v32 = vrot.slane %v200_v19, %v421_v6 }
  0x2e   :  { %v134_v18 = vcombine.high %v126_v11, %v126_v11  ;;  %v161_v20 = vsel %vm95_vm1, %v126_v11, 0.0  ;;  %v198_v22 = vcombine.high %v190_v16, %v190_v16  ;;  %v135_v24 = vcombine.high %v133_v17, %v133_v17  ;;  %p353_p5 = por %p352_p4, %p351_p3 }
  0x2f   :  { %v164_v27 = vsel %vm95_vm1, %v133_v17, 0.0  ;;  %v151_v28 = vcombine.high %v143_v14, %v143_v14  ;;  %v199_v30 = vcombine.high %v197_v21, %v197_v21  ;;  %v225_v34 = vsel %vm95_vm1, %v190_v16, 0.0 }
  0x30   :  { %v162_v26 = vsel %vm95_vm1, %v134_v18, 0.0  ;;  %v166_v31 = vsel %vm95_vm1, %v135_v24, 0.0  ;;  %v226_v35 = vsel %vm95_vm1, %v198_v22, 0.0  ;;  %v228_v36 = vsel %vm95_vm1, %v197_v21, 0.0  ;;  %v116_v24 = vld [vmem:[#allocation3] sm:$0x3]  ;;  %p354_p6 = pnand %p353_p5, %p347_p2 }
  0x31   :  { %v163_v29 = vadd.f32 %v162_v26, %v161_v20  ;;  %v152_v37 = vcombine.high %v150_v25, %v150_v25  ;;  %v168_v38 = vsel %vm95_vm1, %v143_v14, 0.0  ;;  %v215_v39 = vcombine.high %v207_v23, %v207_v23 }
  0x32   :  { %v227_v40 = vadd.f32 %v226_v35, %v225_v34  ;;  %v170_v42 = vsel %vm95_vm1, %v151_v28, 0.0  ;;  %v230_v43 = vsel %vm95_vm1, %v199_v30, 0.0  ;;  %v172_v45 = vsel %vm95_vm1, %v150_v25, 0.0  ;;  %v48_v30 = vld [vmem:[#allocation2] sm:$0x3] }
  0x33   :  { %v165_v33 = vadd.f32 %v164_v27, %v163_v29  ;;  %v216_v46 = vcombine.high %v214_v32, %v214_v32  ;;  %v232_v50 = vsel %vm95_vm1, %v207_v23, 0.0  ;;  %v60_v52 = vrot.slane %v49_v44, %v421_v6  ;;  %v180_v27 = vld [vmem:[#allocation4] sm:$0x3] }
  0x34   :  { %v229_v47 = vadd.f32 %v228_v36, %v227_v40  ;;  %v234_v54 = vsel %vm95_vm1, %v215_v39, 0.0  ;;  %v77_v56 = vrot.slane %v50_v48, %v421_v6  ;;  %v67_v58 = vrot.slane %v53_v51, %v421_v6 }
  0x35   :  { %v167_v41 = vadd.f32 %v166_v31, %v165_v33  ;;  %v68_v59 = vcombine.high %v60_v52, %v60_v52  ;;  %v96_v60 = vsel %vm95_vm1, %v60_v52, 0.0  ;;  %v174_v61 = vsel %vm95_vm1, %v152_v37, 0.0 }
  0x36   :  { %v231_v53 = vadd.f32 %v230_v43, %v229_v47  ;;  %v236_v63 = vsel %vm95_vm1, %v214_v32, 0.0  ;;  %v69_v1 = vcombine.high %v67_v58, %v67_v58  ;;  %v99_v3 = vsel %vm95_vm1, %v67_v58, 0.0 }
  0x37   :  { %v169_v49 = vadd.f32 %v168_v38, %v167_v41  ;;  %v97_v2 = vsel %vm95_vm1, %v68_v59, 0.0  ;;  %v238_v5 = vsel %vm95_vm1, %v216_v46, 0.0  ;;  %v84_v9 = vrot.slane %v70_v55, %v421_v6 }
  0x38   :  { %v233_v62 = vadd.f32 %v232_v50, %v231_v53  ;;  %v98_v7 = vadd.f32 %v97_v2, %v96_v60  ;;  %v85_v10 = vcombine.high %v77_v56, %v77_v56  ;;  %v101_v11 = vsel %vm95_vm1, %v69_v1, 0.0 }
  0x39   :  { %v171_v57 = vadd.f32 %v170_v42, %v169_v49  ;;  %v103_v14 = vsel %vm95_vm1, %v77_v56, 0.0  ;;  %v86_v17 = vcombine.high %v84_v9, %v84_v9  ;;  %v107_v20 = vsel %vm95_vm1, %v84_v9, 0.0 }
  0x3a   :  { %v235_v4 = vadd.f32 %v234_v54, %v233_v62  ;;  %v100_v13 = vadd.f32 %v99_v3, %v98_v7  ;;  %v105_v18 = vsel %vm95_vm1, %v85_v10, 0.0 }
  0x3b   :  { %v173_v0 = vadd.f32 %v172_v45, %v171_v57  ;;  %v109_v6 = vsel %vm95_vm1, %v86_v17, 0.0 }
  0x3c   :  { %v237_v12 = vadd.f32 %v236_v63, %v235_v4  ;;  %v102_v16 = vadd.f32 %v101_v11, %v100_v13 }
  0x3d   :  { %v175_v8 = vadd.f32 %v174_v61, %v173_v0 }
  0x3e   :  { %v239_v15 = vadd.f32 %v238_v5, %v237_v12  ;;  %v104_v19 = vadd.f32 %v103_v14, %v102_v16 }
  0x3f   :  { %176 = vadd.xlane.f32.xlu0 %v175_v8 }
  0x40   :  { %v106_v21 = vadd.f32 %v105_v18, %v104_v19 }
  0x42   :  { %v108_v22 = vadd.f32 %v107_v20, %v106_v21 }
  0x43   :  { %240 = vadd.xlane.f32.xlu0 %v239_v15 }
  0x44   :  { %v110_v23 = vadd.f32 %v109_v6, %v108_v22 }
  0x46   :  { %111 = vadd.xlane.f32.xlu1 %v110_v23 }
  0xcc   :  { %v177_v25 = vpop.xlane.xlu0 %176 }
  0xcd   :  { %v178_v26 = vadd.f32 %v177_v25, %v116_v24 }
  0xcf   :  { %179 = vst.msk [vmem:[#allocation3] sm:$0x3] %vm40_vm0, %v178_v26 }
  0xd0   :  { %v241_v28 = vpop.xlane.xlu0 %240 }
  0xd1   :  { %v242_v29 = vadd.f32 %v241_v28, %v180_v27 }
  0xd3   :  { %243 = vst.msk [vmem:[#allocation4] sm:$0x3] %vm40_vm0, %v242_v29  ;;  %v112_v31 = vpop.xlane.xlu1 %111 }
  0xd4   :  { %v113_v32 = vadd.f32 %v112_v31, %v48_v30 }
  0xd6   :  { %115 = vst.msk [vmem:[#allocation2] sm:$0x3] %vm40_vm0, %v113_v32  ;;  %v248_v33 = vld [vmem:[#allocation3] sm:$0x3] }
  0xda   :  { %v249_v34 = vld [vmem:[#allocation4] sm:$0x3] }
  0xdb   :  { %v252_v35 = vadd.f32 %v249_v34, %v248_v33 }
  0xdd   :  { %v253_v36 = vadd.f32 0.1, %v252_v35  ;;  %v247_v37 = vld [vmem:[#allocation2] sm:$0x3] }
  0xde   :  { %v250_v38 = vadd.f32 0.1, %v247_v37 }
  0xdf   :  { %300 = vrcp.f32 %v253_v36 }
  0xe0   :  { %v251_v39 = vmul.f32 2.0, %v250_v38 }
  0xe9   :  { %v301_v40 = vpop.eup %300 }
  0xea   :  { %v255_v41 = vmul.f32 %v301_v40, %v251_v39 }
  0xec   :  { %v256_v42 = vsel %vm40_vm0, %v255_v41, 0.0 }
  0xed   :  { %257 = vadd.xlane.f32.xlu1 %v256_v42 }
 0x17a   :  { %v258_v43 = vpop.xlane.xlu1 %257 }
 0x17b   :  { %v259_v44 = vrot.slane %v258_v43, 4 }
 0x17d   :  { %v260_v45 = vadd.f32 %v259_v44, %v258_v43 }
 0x17f   :  { %v261_v46 = vrot.slane %v260_v45, 2 }
 0x181   :  { %v262_v47 = vadd.f32 %v261_v46, %v260_v45 }
 0x183   :  { %v263_v48 = vrot.slane %v262_v47, 1 }
 0x185   :  { %v264_v49 = vadd.f32 %v263_v48, %v262_v47 }
 0x187   :  { %289 = vpush %v264_v49 }
 0x1b8   :  { %s290_s1 = spop %289 }
 0x1b9   :  { %s268_s4 = smul.f32 0.5, %s290_s1 }
 0x1bb   :  { %s269_s7 = ssub.f32 1.0, %s268_s4 }
 0x1bd   :  { %v270_v50 = vstv %s269_s7 }
 0x1be   :  { %272 = vst.msk [vmem:[#allocation10] sm:$0x1] %vm271_vm2, %v270_v50 }
 0x1bf   :  { %357 = shalt.err (!%p354_p6)
}
 0x1c0   :  { %s358_s12 = scalar_lea.hbm %s477_s2, 16 }
 0x1c1   :  { %p359_p7 = scmp.ne.s32.totalorder %s477_s2, %s358_s12  ;;  %p362_p8 = scmp.lt.u32.totalorder %s358_s12, %s477_s2 }
 0x1c3   :  { %p364_p9 = pnand %p362_p8, %p359_p7 }
 0x1c5   :  { %367 = shalt.err (!%p364_p9)
}
 0x1c6   :  { %282 = dma.vmem_to_hbm [thread:$0]  %s280_s6, 16, %s477_s2, [#allocation7]  }
 0x1c7   :  { %372 = dma.done.wait [#allocation7], 16  }
 0x1c8   :  { %373 = vsyncadd [#allocation7], 4294967280 }
 0x1c9   :  { %286 = vsyncpa [#allocation6], 1 }
 0x1ca   :  { %287 = vsyncpa [#allocation9], 1 }
 0x1cb   :  { %288 = vsyncpa [#allocation7], 1 }

</bundles_post_ra>
